<compile_context>
chip_gen: v7x
topology: tpu7x:2x2x1
jax: 0.10.0
libtpu: 0.0.40
codegen_flags: <defaults>
</compile_context>

<pallas_src>
import math

import jax
import jax.numpy as jnp
from jax.experimental import pallas as pl
from jax.experimental.pallas import tpu as pltpu


def _round_up(x, m):
    return ((x + m - 1) // m) * m


def _pick_tile(n, target, align):
    """Largest multiple of `align` that divides n and is <= target (else full n)."""
    if n <= target:
        return n
    best = None
    t = align
    while t <= target:
        if n % t == 0:
            best = t
        t += align
    return best if best is not None else n


# ---------------- Stage 1: feature transform  Y = (h @ W) * norm ----------------
def gcn_transform_kernel(h_ref, w_ref, norm_ref, y_ref):
    xw = jnp.dot(h_ref[...], w_ref[...], preferred_element_type=jnp.float32)
    y_ref[...] = xw * norm_ref[...]


# -------- Stage 2: tiled aggregation  out = relu((A @ Y) * norm + bias) ---------
def gcn_aggregate_kernel(adj_ref, y_ref, norm_ref, bias_ref, out_ref, acc_ref):
    k = pl.program_id(1)

    @pl.when(k == 0)
    def _():
        acc_ref[...] = jnp.zeros_like(acc_ref)

    acc_ref[...] += jnp.dot(adj_ref[...], y_ref[...],
                            preferred_element_type=jnp.float32)

    @pl.when(k == pl.num_programs(1) - 1)
    def _():
        res = acc_ref[...] * norm_ref[...] + bias_ref[...]
        out_ref[...] = jnp.maximum(res, 0.0).astype(out_ref.dtype)


def gcn_layer(adj, norm, h, weight, bias, *, tile_m=512, tile_k=512):
    """Fused GCN layer forward.
    adj:(N,N)  norm:(N,1)  h:(N,F_in)  weight:(F_in,F_out)  bias:(F_out,)
    Note: F_out <= F_in here, so transform-then-aggregate is the cheaper order;
    for layers with F_out > F_in the aggregation should be done in F_in instead.
    """
    N, F_in = h.shape
    F_out = weight.shape[1]
    assert adj.shape == (N, N) and norm.shape == (N, 1)

    # Lane-dense feature padding (F_out=16 would otherwise drive 16/128 lanes
    # and force masked partial stores).
    F_pad = _round_up(max(F_out, 128), 128)
    w_pad = jnp.zeros((F_in, F_pad), weight.dtype).at[:, :F_out].set(weight)
    b_pad = jnp.zeros((1, F_pad), bias.dtype).at[0, :F_out].set(bias)

    # Tile sizes: sublane axis aligned to 8, reduction/lane axis aligned to 128.
    TM = _pick_tile(N, tile_m, 8)
    TK = _pick_tile(N, tile_k, 128)

    # VMEM budget (double-buffered inputs/outputs + accumulator) with headroom,
    # capped at 48 MiB so it is safe on v7x's 64 MiB VMEM.
    est = 4 * (2 * TM * TK + 2 * TK * F_pad + 2 * TM + 2 * F_pad
               + 2 * TM * F_pad + TM * F_pad)
    vmem_limit = int(min(max(2 * est, 32 << 20), 48 << 20))

    # --- Stage 1: Y = (h @ W_pad) * norm, computed once (hoisted out of the
    #     aggregation loop), lane-padded, fp32. ---
    y = pl.pallas_call(
        gcn_transform_kernel,
        out_shape=jax.ShapeDtypeStruct((N, F_pad), jnp.float32),
        grid_spec=pl.GridSpec(
            grid=(N // TM,),
            in_specs=[
                pl.BlockSpec((TM, F_in), lambda i: (i, 0)),
                pl.BlockSpec((F_in, F_pad), lambda i: (0, 0)),
                pl.BlockSpec((TM, 1), lambda i: (i, 0)),
            ],
            out_specs=pl.BlockSpec((TM, F_pad), lambda i: (i, 0)),
        ),
        compiler_params=pltpu.CompilerParams(
            dimension_semantics=("parallel",)),
    )(h, w_pad, norm)

    # --- Stage 2: tiled aggregation with resident fp32 accumulator.
    #     Row tiles are independent ("parallel", shards across v7x's 2 TCs);
    #     the K/reduction axis is last and "arbitrary". ---
    out_pad = pl.pallas_call(
        gcn_aggregate_kernel,
        out_shape=jax.ShapeDtypeStruct((N, F_pad), h.dtype),
        grid_spec=pltpu.PrefetchScalarGridSpec(
            num_scalar_prefetch=0,
            grid=(N // TM, N // TK),
            in_specs=[
                pl.BlockSpec((TM, TK), lambda i, k: (i, k)),      # adjacency tile
                pl.BlockSpec((TK, F_pad), lambda i, k: (k, 0)),   # Y tile
                pl.BlockSpec((TM, 1), lambda i, k: (i, 0)),       # post-norm
                pl.BlockSpec((1, F_pad), lambda i, k: (0, 0)),    # bias
            ],
            out_specs=pl.BlockSpec((TM, F_pad), lambda i, k: (i, 0)),
            scratch_shapes=[pltpu.VMEM((TM, F_pad), jnp.float32)],
        ),
        compiler_params=pltpu.CompilerParams(
            dimension_semantics=("parallel", "arbitrary"),
            vmem_limit_bytes=vmem_limit),
    )(adj, y, norm, b_pad)

    # Slice off the lane padding.
    return out_pad[:, :F_out]


def gcn_ref(adj, norm, h, weight, bias):
    """Pure-JAX reference for validation."""
    x = h @ weight
    x = x * norm
    x = adj @ x
    x = x * norm
    x = x + bias[None, :]
    return jnp.maximum(x, 0.0)


if __name__ == "__main__":
    def make_inputs(key, n, f_in, f_out):
        k_feat, k_w, k_b, k_edge = jax.random.split(key, 4)
        h = jax.random.normal(k_feat, (n, f_in), dtype=jnp.float32)
        # Deterministic parameter init matching reset_parameters():
        #   uniform(-stdv, stdv), stdv = 1/sqrt(out_feats)
        stdv = 1.0 / math.sqrt(f_out)
        weight = jax.random.uniform(k_w, (f_in, f_out),
                                    minval=-stdv, maxval=stdv, dtype=jnp.float32)
        bias = jax.random.uniform(k_b, (f_out,),
                                  minval=-stdv, maxval=stdv, dtype=jnp.float32)
        # Synthetic sparse symmetric adjacency with self-loops (dense storage).
        edge_probs = jax.random.uniform(k_edge, (n, n))
        adj = (edge_probs < 0.1).astype(jnp.float32)
        adj = jnp.maximum(adj, adj.T)
        adj = jnp.maximum(adj, jnp.eye(n, dtype=jnp.float32))
        # Symmetric GCN normalization: norm_i = 1/sqrt(deg_i), stored as (N, 1).
        deg = adj.sum(axis=1, keepdims=True)
        norm = 1.0 / jnp.sqrt(deg)
        return adj, norm, h, weight, bias

    key = jax.random.PRNGKey(0)
    k1, k2 = jax.random.split(key)

    # TODO(synk): dropout (p=0.0 here) is a no-op at inference; training-mode
    # dropout would need pltpu.prng_seed + pltpu.stateful_bernoulli in-kernel.

    # Case 1: module-consistent small shapes (single tile).
    adj, norm, h, weight, bias = make_inputs(k1, 64, 32, 16)
    out = jax.block_until_ready(gcn_layer(adj, norm, h, weight, bias))
    ref = gcn_ref(adj, norm, h, weight, bias)
    assert out.shape == (64, 16)
    assert jnp.allclose(out, ref, atol=1e-5, rtol=1e-5), "mismatch vs reference (case 1)"

    # Case 2: still small, but forces a multi-tile grid (4 row tiles x 2 K tiles)
    # to exercise the accumulator init / reduce / epilogue path.
    adj2, norm2, h2, weight2, bias2 = make_inputs(k2, 256, 32, 16)
    out2 = jax.block_until_ready(
        gcn_layer(adj2, norm2, h2, weight2, bias2, tile_m=64, tile_k=128))
    ref2 = gcn_ref(adj2, norm2, h2, weight2, bias2)
    assert out2.shape == (256, 16)
    assert jnp.allclose(out2, ref2, atol=1e-5, rtol=1e-5), "mismatch vs reference (case 2)"

    print("KERNEL_OK")
</pallas_src>

<mosaic_0001>
module attributes {stable_mosaic.version = 11 : i64} {
  func.func @gcn_transform_kernel(%arg0: i32, %arg1: memref<64x32xf32, #tpu.memory_space<vmem>>, %arg2: memref<32x128xf32, #tpu.memory_space<vmem>>, %arg3: memref<64x1xf32, #tpu.memory_space<vmem>>, %arg4: memref<64x128xf32, #tpu.memory_space<vmem>>) attributes {dimension_semantics = [#tpu.dimension_semantics<parallel>], iteration_bounds = array<i64: 1>, scalar_prefetch = 0 : i64, scratch_operands = 0 : i64, tpu.core_type = #tpu.core_type<tc>, window_params = [{transform_indices = @transform_0, window_bounds = array<i64: 64, 32>}, {pipeline_mode = #tpu.pipeline_mode<synchronous>, transform_indices = @transform_1, window_bounds = array<i64: 32, 128>}, {transform_indices = @transform_2, window_bounds = array<i64: 64, 1>}, {transform_indices = @transform_3, window_bounds = array<i64: 64, 128>}]} {
    %c0 = arith.constant 0 : index
    %c0_0 = arith.constant 0 : index
    %0 = vector.load %arg1[%c0, %c0_0] : memref<64x32xf32, #tpu.memory_space<vmem>>, vector<64x32xf32>
    %c0_1 = arith.constant 0 : index
    %c0_2 = arith.constant 0 : index
    %1 = vector.load %arg2[%c0_1, %c0_2] : memref<32x128xf32, #tpu.memory_space<vmem>>, vector<32x128xf32>
    %cst = arith.constant dense<0.000000e+00> : vector<64x128xf32>
    %2 = tpu.matmul %0, %1, %cst {dimension_numbers = #tpu.dot_dimension_numbers<[1], [0], [0], [1], [0, 0, 1, 1], [], []>} : vector<64x32xf32>, vector<32x128xf32>, vector<64x128xf32> -> vector<64x128xf32>
    %c0_3 = arith.constant 0 : index
    %c0_4 = arith.constant 0 : index
    %3 = vector.load %arg3[%c0_3, %c0_4] : memref<64x1xf32, #tpu.memory_space<vmem>>, vector<64x1xf32>
    %4 = vector.broadcast %3 : vector<64x1xf32> to vector<64x128xf32>
    %5 = arith.mulf %2, %4 : vector<64x128xf32>
    %c0_5 = arith.constant 0 : index
    %c0_6 = arith.constant 0 : index
    %6 = vector.load %arg4[%c0_5, %c0_6] : memref<64x128xf32, #tpu.memory_space<vmem>>, vector<64x128xf32>
    tpu.vector_store %arg4[%c0_5, %c0_6], %5 {strides = array<i32>} : memref<64x128xf32, #tpu.memory_space<vmem>>, vector<64x128xf32>,
    return
  }
  func.func @transform_0(%arg0: i32) -> (i32, i32) {
    %c0_i32 = arith.constant 0 : i32
    %c0_i32_0 = arith.constant 0 : i32
    return %arg0, %c0_i32 : i32, i32
  }
  func.func @transform_1(%arg0: i32) -> (i32, i32) {
    %c0_i32 = arith.constant 0 : i32
    %c0_i32_0 = arith.constant 0 : i32
    %c0_i32_1 = arith.constant 0 : i32
    return %c0_i32, %c0_i32_0 : i32, i32
  }
  func.func @transform_2(%arg0: i32) -> (i32, i32) {
    %c0_i32 = arith.constant 0 : i32
    %c0_i32_0 = arith.constant 0 : i32
    return %arg0, %c0_i32 : i32, i32
  }
  func.func @transform_3(%arg0: i32) -> (i32, i32) {
    %c0_i32 = arith.constant 0 : i32
    %c0_i32_0 = arith.constant 0 : i32
    return %arg0, %c0_i32 : i32, i32
  }
}

</mosaic_0001>

<bundles_post_ra>
// kernel: tpu_custom_call.1
= control target key start
LH: loop header
LB: loop body
LE: loop exit
PB: predicated region body
PF: predicated region fallthrough
CT: control target
= control target key end

     0   :  { %vm27_vm0 = vcmask 261120   ;;  %v319_v7 = vmov 0   ;;  %s423_s0 = inlined_call_operand.vmem [shape: f32[64,32], index: 0, kind: input, shape index: {}]   ;;  %s424_s1 = inlined_call_operand.vmem [shape: f32[32,128], index: 1, kind: input, shape index: {}]   ;;  %s425_s2 = inlined_call_operand.vmem [shape: f32[64,1], index: 2, kind: input, shape index: {}]   ;;  %s426_s3 = inlined_call_operand.hbm [shape: f32[64,128], index: 3, kind: output, shape index: {}]  }
   0x1   :  { %v23_v0 = vld [vmem:[%s424_s1] sm:$0xff]  ;;  %v24_v1 = vld [vmem:[%s424_s1 + $0x8] sm:$0xff]  ;;  %v25_v2 = vld [vmem:[%s424_s1 + $0x10] sm:$0xff]  ;;  %294 = vset.pattern.permute.xlu1 %v319_v7  ;;  %293 = vset.pattern.permute.xlu0 %v319_v7 }
   0x2   :  { %v277_v3 = vpack.c.bf16 %v24_v1, %v23_v0  ;;  %v26_v4 = vld [vmem:[%s424_s1 + $0x18] sm:$0xff]  ;;  %v15_v5 = vld [vmem:[%s423_s0] sm:$0xff]  ;;  %v159_v9 = vld [vmem:[%s425_s2 + $0x10] sm:$0xff] }
   0x3   :  { %v19_v6 = vld [vmem:[%s423_s0 + $0x20] sm:$0xff]  ;;  %v281_v8 = vpack.c.bf16 %v26_v4, %v25_v2  ;;  %265 = vmatprep.mubr.msk.f32.mxu0 %vm27_vm0, %v15_v5  ;;  %177 = vperm.xlu1 %294, %v159_v9  }
   0x4   :  { %271 = vmatprep.mubr.msk.f32.mxu1 %vm27_vm0, %v19_v6  ;;  %278 = vmatprep.subr.bf16.mxu0 %v277_v3  ;;  %v157_v10 = vld [vmem:[%s425_s2] sm:$0xff] }
   0x5   :  { %285 = vmatprep.subr.bf16.mxu1 %v277_v3  ;;  %280 = vmatpush3.bf16.msra.mxu0 %v277_v3 }
   0x6   :  { %287 = vmatpush3.bf16.msra.mxu1 %v277_v3  ;;  %282 = vmatprep.subr.bf16.mxu0 %v281_v8 }
   0x7   :  { %286 = vmatprep.subr.bf16.mxu1 %v281_v8  ;;  %167 = vperm.xlu0 %293, %v157_v10  }
   0x8   :  { %8 = vsyncpa [#allocation3], 0  ;;  %v160_v11 = vld [vmem:[%s425_s2 + $0x18] sm:$0xff]  ;;  %v158_v12 = vld [vmem:[%s425_s2 + $0x8] sm:$0xff] }
   0x9   :  { %284 = vmatpush3.bf16.msra.mxu0 %v281_v8  ;;  %v16_v13 = vld [vmem:[%s423_s0 + $0x8] sm:$0xff]  ;;  %v17_v15 = vld [vmem:[%s423_s0 + $0x10] sm:$0xff]  ;;  %182 = vperm.xlu1 %294, %v160_v11   ;;  %v161_v18 = vld [vmem:[%s425_s2 + $0x20] sm:$0xff] }
   0xa   :  { %288 = vmatpush3.bf16.msra.mxu1 %v281_v8  ;;  %v20_v14 = vld [vmem:[%s423_s0 + $0x28] sm:$0xff]  ;;  %v21_v16 = vld [vmem:[%s423_s0 + $0x30] sm:$0xff]  ;;  %v18_v19 = vld [vmem:[%s423_s0 + $0x18] sm:$0xff] }
   0xb   :  { %172 = vperm.xlu0 %293, %v158_v12   ;;  %v162_v17 = vld [vmem:[%s425_s2 + $0x28] sm:$0xff]  ;;  %v22_v20 = vld [vmem:[%s423_s0 + $0x38] sm:$0xff]  ;;  %v163_v22 = vld [vmem:[%s425_s2 + $0x30] sm:$0xff]  ;;  %s320_s0 = smov [#allocation2]  }
   0xc   :  { %266 = vmatmul.mubr.msk.f32.vlgmr.msra.gmra.mrb[0].mxu0 %vm27_vm0, %v16_v13  ;;  %v164_v21 = vld [vmem:[%s425_s2 + $0x38] sm:$0xff]  ;;  %s226_s1 = sshll.u32 %s320_s0, 4  ;;  %s227_s1 = int_to_ptr.vmem [resolvable:$true] %s226_s1 }
   0xd   :  { %272 = vmatmul.mubr.msk.f32.vlgmr.msra.gmra.mrb[0].mxu1 %vm27_vm0, %v20_v14  ;;  %268 = vmatprep.mubr.msk.f32.mxu0 %vm27_vm0, %v17_v15  ;;  %s295_s2 = scalar_lea.vmem %s227_s1, 1024  ;;  %p300_p1 = scmp.lt.s32.totalorder %s227_s1, %s227_s1 }
   0xe   :  { %274 = vmatprep.mubr.msk.f32.mxu1 %vm27_vm0, %v21_v16  ;;  %192 = vperm.xlu1 %294, %v162_v17   ;;  %p296_p0 = scmp.ne.s32.totalorder %s227_s1, %s295_s2  ;;  %p301_p2 = scmp.lt.s32.totalorder %s295_s2, %s295_s2 }
   0xf   :  { %187 = vperm.xlu0 %293, %v161_v18  }
  0x10   :  { %269 = vmatmul.mubr.msk.f32.gmra.mrb[2].mxu0 %vm27_vm0, %v18_v19  ;;  %p302_p3 = por %p301_p2, %p300_p1 }
  0x11   :  { %275 = vmatmul.mubr.msk.f32.gmra.mrb[2].mxu1 %vm27_vm0, %v22_v20 }
  0x12   :  { %202 = vperm.xlu1 %294, %v164_v21   ;;  %p303_p4 = pnand %p302_p3, %p296_p0 }
  0x13   :  { %197 = vperm.xlu0 %293, %v163_v22  }
  0x82   :  { %v178_v23 = vpop.permute.xlu1 %177 }
  0x86   :  { %v168_v24 = vpop.permute.xlu0 %167 }
  0x88   :  { %v183_v25 = vpop.permute.xlu1 %182 }
  0x8a   :  { %v173_v26 = vpop.permute.xlu0 %172 }
  0x8d   :  { %v193_v27 = vpop.permute.xlu1 %192 }
  0x8e   :  { %v188_v28 = vpop.permute.xlu0 %187 }
  0x91   :  { %v203_v37 = vpop.permute.xlu1 %202 }
  0x92   :  { %v198_v38 = vpop.permute.xlu0 %197 }
  0xdf   :  { %v267_v29 = vpop.f32.mrb[0].mxu0 }
  0xe0   :  { %v273_v30 = vpop.f32.mrb[0].mxu1  ;;  %v206_v31 = vmul.f32 %v267_v29, %v173_v26  ;;  %v118_v33 = vpop.f32.mrb[1].mxu0 }
  0xe1   :  { %v210_v32 = vmul.f32 %v273_v30, %v193_v27  ;;  %v138_v34 = vpop.f32.mrb[1].mxu1  ;;  %v205_v35 = vmul.f32 %v168_v24, %v118_v33 }
  0xe2   :  { %v209_v36 = vmul.f32 %v188_v28, %v138_v34  ;;  %214 = vst [vmem:[#allocation2 + $0x8] sm:$0xff] %v206_v31 }
  0xe3   :  { %218 = vst [vmem:[#allocation2 + $0x28] sm:$0xff] %v210_v32  ;;  %213 = vst [vmem:[#allocation2] sm:$0xff] %v205_v35  ;;  %v270_v39 = vpop.f32.mrb[2].mxu0 }
  0xe4   :  { %217 = vst [vmem:[#allocation2 + $0x20] sm:$0xff] %v209_v36  ;;  %v276_v40 = vpop.f32.mrb[2].mxu1  ;;  %v208_v41 = vmul.f32 %v270_v39, %v183_v25  ;;  %v128_v43 = vpop.f32.mrb[3].mxu0 }
  0xe5   :  { %v212_v42 = vmul.f32 %v276_v40, %v203_v37  ;;  %v148_v44 = vpop.f32.mrb[3].mxu1  ;;  %v207_v45 = vmul.f32 %v178_v23, %v128_v43 }
  0xe6   :  { %v211_v46 = vmul.f32 %v198_v38, %v148_v44  ;;  %216 = vst [vmem:[#allocation2 + $0x18] sm:$0xff] %v208_v41 }
  0xe7   :  { %220 = vst [vmem:[#allocation2 + $0x38] sm:$0xff] %v212_v42  ;;  %215 = vst [vmem:[#allocation2 + $0x10] sm:$0xff] %v207_v45 }
  0xe8   :  { %219 = vst [vmem:[#allocation2 + $0x30] sm:$0xff] %v211_v46 }
  0xe9   :  { %306 = shalt.err (!%p303_p4)
}
  0xea   :  { %s307_s26 = scalar_lea.hbm %s426_s3, 1024 }
  0xeb   :  { %p308_p5 = scmp.ne.s32.totalorder %s426_s3, %s307_s26  ;;  %p311_p6 = scmp.lt.u32.totalorder %s307_s26, %s426_s3 }
  0xed   :  { %p313_p7 = pnand %p311_p6, %p308_p5 }
  0xef   :  { %316 = shalt.err (!%p313_p7)
}
  0xf0   :  { %s321_s4 = smov 128   ;;  %s322_s5 = smov 8  }
  0xf1   :  { %232 = dma.vmem_to_hbm [thread:$0]  %s227_s1, 1024, %s426_s3, [#allocation3], %s321_s4, %s321_s4, %s322_s5  }
  0xf2   :  { %317 = dma.done.wait [#allocation3], 1024  }
  0xf3   :  { %318 = vsyncadd [#allocation3], 4294966272 }
  0xf4   :  { %236 = vsyncpa [#allocation3], 1 }

</bundles_post_ra>
